<compile_context>
chip_gen: v7x
topology: tpu7x:2x2x1
jax: 0.10.0
libtpu: 0.0.40
codegen_flags: <defaults>
</compile_context>

<pallas_src>
import math

import jax
import jax.numpy as jnp
from jax import lax
from jax.experimental import pallas as pl
from jax.experimental.pallas import tpu as pltpu


def _round_up(x, m):
    return ((x + m - 1) // m) * m


def _location_kernel(p_ref, wf_ref, o_ref):
    # p_ref : (tq, KCp)  patch tile (im2col already done by the wrapper)
    # wf_ref: (KCp, A)   fused conv∘linear weight, resident for the grid
    # o_ref : (tq, A)    written directly in the output dtype
    o_ref[...] = jnp.dot(
        p_ref[...], wf_ref[...], preferred_element_type=jnp.float32
    ).astype(o_ref.dtype)


def location_layer_forward(x, w_conv, w_dense, *, tq_max=256,
                           compute_dtype=jnp.float32):
    """x: [B, 2, T], w_conv: [F, 2, K], w_dense: [A, F] -> [B, T, A]."""
    B, C, T = x.shape
    Fch, Cw, K = w_conv.shape
    assert C == Cw == 2
    assert K % 2 == 1, "only odd kernel sizes match PyTorch 'same' padding"
    A, Fd = w_dense.shape
    assert Fd == Fch
    pad = (K - 1) // 2

    # Time tiling: tq rows per grid step (multiple of 8); partial tail blocks
    # are masked by Pallas, so no output slicing is needed.
    tq = min(tq_max, _round_up(T, 8))
    nt = pl.cdiv(T, tq)

    # --- Wrapper-side im2col (single fused XLA pad + K slices + concat). ---
    # patch[b, t, k*C + c] = x[b, c, t + k - pad]  (zero outside [0, T))
    x_t = jnp.transpose(x, (0, 2, 1))                     # [B, T, C]
    x_p = jnp.pad(x_t, ((0, 0), (pad, pad), (0, 0)))      # [B, T + 2*pad, C]
    patch = jnp.concatenate([x_p[:, k:k + T, :] for k in range(K)], axis=-1)
    KC = K * C
    KCp = _round_up(KC, 8)                                # 62 -> 64
    patch = jnp.pad(patch, ((0, 0), (0, 0), (0, KCp - KC))).astype(compute_dtype)

    # Fused weight: Wf[k*C + c, a] = sum_f w_conv[f, c, k] * w_dense[a, f].
    w_fused = jnp.einsum(
        "fck,af->kca", w_conv.astype(jnp.float32), w_dense.astype(jnp.float32)
    ).reshape(KC, A)
    w_fused = jnp.pad(w_fused, ((0, KCp - KC), (0, 0))).astype(compute_dtype)

    out_dtype = x.dtype
    csz = jnp.dtype(compute_dtype).itemsize
    cost = pl.CostEstimate(
        flops=2 * B * T * KCp * A,
        transcendentals=0,
        bytes_accessed=(B * T * KCp * csz + KCp * A * csz
                        + B * T * A * jnp.dtype(out_dtype).itemsize),
    )

    out = pl.pallas_call(
        _location_kernel,
        out_shape=jax.ShapeDtypeStruct((B, T, A), out_dtype),
        grid_spec=pltpu.PrefetchScalarGridSpec(
            num_scalar_prefetch=0,
            grid=(B, nt),
            in_specs=[
                # Pipelined patch tiles: (tq, KCp) per step.
                pl.BlockSpec((None, tq, KCp), lambda b, j: (b, j, 0)),
                # Fused weight: constant index_map -> resident for the grid.
                pl.BlockSpec((KCp, A), lambda b, j: (0, 0)),
            ],
            out_specs=pl.BlockSpec((None, tq, A), lambda b, j: (b, j, 0)),
        ),
        compiler_params=pltpu.CompilerParams(
            dimension_semantics=("parallel", "parallel")),
        cost_estimate=cost,
    )(patch, w_fused)

    return out


def _xavier_uniform(key, shape, fan_in, fan_out, gain):
    bound = gain * math.sqrt(6.0 / (fan_in + fan_out))
    return jax.random.uniform(key, shape, jnp.float32, minval=-bound, maxval=bound)


def make_params(key, attention_n_filters, attention_kernel_size, attention_dim):
    k_conv, k_dense = jax.random.split(key)
    K = attention_kernel_size
    # Conv1d weight [out_channels, in_channels, K]; xavier gain('linear') = 1.0
    w_conv = _xavier_uniform(k_conv, (attention_n_filters, 2, K),
                             fan_in=2 * K, fan_out=attention_n_filters * K, gain=1.0)
    # Linear weight [out, in]; xavier gain('tanh') = 5/3
    w_dense = _xavier_uniform(k_dense, (attention_dim, attention_n_filters),
                              fan_in=attention_n_filters, fan_out=attention_dim,
                              gain=5.0 / 3.0)
    return w_conv, w_dense


def _reference(x, w_conv, w_dense):
    # Pure-JAX reference: Conv1d (NCW) -> transpose -> Linear, matching PyTorch.
    K = w_conv.shape[-1]
    pad = (K - 1) // 2
    h = lax.conv_general_dilated(
        x, w_conv, window_strides=(1,), padding=[(pad, pad)],
        dimension_numbers=("NCH", "OIH", "NCH"),
        precision=lax.Precision.HIGHEST)                   # [B, F, T]
    h = jnp.transpose(h, (0, 2, 1))                        # [B, T, F]
    return jnp.einsum("btf,af->bta", h, w_dense,
                      precision=lax.Precision.HIGHEST)     # [B, T, A]


if __name__ == "__main__":
    B, T = 2, 64
    attention_n_filters = 32       # Tacotron2 defaults
    attention_kernel_size = 31
    attention_dim = 128            # lane-dense output (multiple of 128)

    key = jax.random.PRNGKey(0)
    k_params, k_x = jax.random.split(key)
    w_conv, w_dense = make_params(k_params, attention_n_filters,
                                  attention_kernel_size, attention_dim)

    # attention_weights_cat: [B, 2, T]  (stacked attn weights + cumulative weights)
    x = jax.random.uniform(k_x, (B, 2, T), jnp.float32)

    out = jax.block_until_ready(location_layer_forward(x, w_conv, w_dense))
    ref = _reference(x, w_conv, w_dense)

    assert out.shape == (B, T, attention_dim)
    max_err = float(jnp.max(jnp.abs(out - ref)))
    assert jnp.allclose(out, ref, atol=2e-2, rtol=2e-2), (
        f"mismatch vs reference (max abs err {max_err})")

    print("KERNEL_OK")
</pallas_src>

<mosaic_0001>
module attributes {stable_mosaic.version = 11 : i64} {
  func.func @_location_kernel(%arg0: i32, %arg1: i32, %arg2: memref<1x64x64xf32, #tpu.memory_space<vmem>>, %arg3: memref<64x128xf32, #tpu.memory_space<vmem>>, %arg4: memref<1x64x128xf32, #tpu.memory_space<vmem>>) attributes {dimension_semantics = [#tpu.dimension_semantics<parallel>, #tpu.dimension_semantics<parallel>], iteration_bounds = array<i64: 2, 1>, scalar_prefetch = 0 : i64, scratch_operands = 0 : i64, tpu.core_type = #tpu.core_type<tc>, window_params = [{transform_indices = @transform_0, window_bounds = array<i64: 1, 64, 64>}, {pipeline_mode = #tpu.pipeline_mode<synchronous>, transform_indices = @transform_1, window_bounds = array<i64: 64, 128>}, {transform_indices = @transform_2, window_bounds = array<i64: 1, 64, 128>}]} {
    %c0 = arith.constant 0 : index
    %c0_0 = arith.constant 0 : index
    %c0_1 = arith.constant 0 : index
    %0 = vector.load %arg2[%c0, %c0_0, %c0_1] : memref<1x64x64xf32, #tpu.memory_space<vmem>>, vector<1x64x64xf32>
    %1 = vector.shape_cast %0 : vector<1x64x64xf32> to vector<64x64xf32>
    %c0_2 = arith.constant 0 : index
    %c0_3 = arith.constant 0 : index
    %2 = vector.load %arg3[%c0_2, %c0_3] : memref<64x128xf32, #tpu.memory_space<vmem>>, vector<64x128xf32>
    %cst = arith.constant dense<0.000000e+00> : vector<64x128xf32>
    %3 = tpu.matmul %1, %2, %cst {dimension_numbers = #tpu.dot_dimension_numbers<[1], [0], [0], [1], [0, 0, 1, 1], [], []>} : vector<64x64xf32>, vector<64x128xf32>, vector<64x128xf32> -> vector<64x128xf32>
    %c0_4 = arith.constant 0 : index
    %c0_5 = arith.constant 0 : index
    %c0_6 = arith.constant 0 : index
    %4 = vector.load %arg4[%c0_4, %c0_5, %c0_6] : memref<1x64x128xf32, #tpu.memory_space<vmem>>, vector<1x64x128xf32>
    %5 = vector.shape_cast %4 : vector<1x64x128xf32> to vector<64x128xf32>
    %6 = vector.shape_cast %3 : vector<64x128xf32> to vector<1x64x128xf32>
    tpu.vector_store %arg4[%c0_4, %c0_5, %c0_6], %6 {strides = array<i32>} : memref<1x64x128xf32, #tpu.memory_space<vmem>>, vector<1x64x128xf32>,
    return
  }
  func.func @transform_0(%arg0: i32, %arg1: i32) -> (i32, i32, i32) {
    %c0_i32 = arith.constant 0 : i32
    %c0_i32_0 = arith.constant 0 : i32
    return %arg0, %arg1, %c0_i32 : i32, i32, i32
  }
  func.func @transform_1(%arg0: i32, %arg1: i32) -> (i32, i32) {
    %c0_i32 = arith.constant 0 : i32
    %c0_i32_0 = arith.constant 0 : i32
    %c0_i32_1 = arith.constant 0 : i32
    return %c0_i32, %c0_i32_0 : i32, i32
  }
  func.func @transform_2(%arg0: i32, %arg1: i32) -> (i32, i32, i32) {
    %c0_i32 = arith.constant 0 : i32
    %c0_i32_0 = arith.constant 0 : i32
    return %arg0, %arg1, %c0_i32 : i32, i32, i32
  }
}

</mosaic_0001>

<bundles_post_ra>
// kernel: tpu_custom_call.1
= control target key start
LH: loop header
LB: loop body
LE: loop exit
PB: predicated region body
PF: predicated region fallthrough
CT: control target
= control target key end

     0   :  { %7 = vsyncpa [#allocation3], 0  ;;  %s1051_s0 = inlined_call_operand.hbm [shape: f32[2,64,64], index: 0, kind: input, shape index: {}]   ;;  %s1052_s1 = inlined_call_operand.hbm [shape: f32[64,128], index: 1, kind: input, shape index: {}]   ;;  %s1053_s2 = inlined_call_operand.hbm [shape: f32[2,64,128], index: 2, kind: output, shape index: {}]  }
   0x1   :  { %9 = vsyncpa [#allocation3 + $0x1], 0 }
   0x2   :  { %10 = vsyncpa [#allocation6], 0 }
   0x3   :  { %11 = vsyncpa [#allocation4], 0 }
   0x4   :  { %13 = vsyncpa [#allocation4 + $0x1], 0  ;;  %s804_s9 = smov 0   ;;  %s806_s10 = smov 0  }
   0x5   :  { %s808_s11 = smov 0   ;;  %s810_s12 = smov 0  }
   0x6   :  { %s812_s13 = smov 0   ;;  %s814_s14 = smov 0  }
   0x7 LB: > { %s464_s15 = sadd.s32 4294967295, %s780_s14   ;;  %s465_s16 = sadd.s32 4294967294, %s780_s14   ;;  %s780_s14 = sphi %s814_s14, %s19_s14   ;;  %s776_s13 = sphi %s812_s13, %s1077_s13   ;;  %s772_s12 = sphi %s810_s12, %s1076_s12   ;;  %s768_s11 = sphi %s808_s11, %s1075_s11   ;;  %s764_s10 = sphi %s806_s10, %s1074_s10   ;;  %s760_s9 = sphi %s804_s9, %s1073_s9  }
   0x8   : > { %p53_p0 = scmp.ne.s32.totalorder %s764_s10, %s760_s9  ;;  %p838_p1 = scmp.eq.s32.totalorder %s464_s15, 0 }
   0x9   : > { %p842_p2 = scmp.eq.s32.totalorder %s464_s15, 1  ;;  %p106_p3 = scmp.eq.s32.totalorder %s465_s16, 1 }
   0xa   : > { %s1058_s17 = scalar_select %p838_p1, 1, 0 }
   0xb   : > { %s1059_s18 = scalar_select %p842_p2, 1, 0 }
   0xc   : > { %p848_p4 = por %p838_p1, %p53_p0  ;;  %p466_p5 = scmp.ge.s32.totalorder %s780_s14, 1 }
   0xd   : > { %p853_p6 = por %p106_p3, %p53_p0  ;;  %p113_p7 = scmp.lt.s32.totalorder %s780_s14, 3 }
   0xe   : > { %s1060_s19 = scalar_select %p848_p4, 1, 0 }
   0xf   : > { %s1061_s20 = scalar_select %p853_p6, 1, 0 }
  0x10   : > { %p858_p8 = pnand %p466_p5, %p113_p7  ;;  %s782_s22 = smov [#allocation5]  }
  0x11   : > { %s125_s23 = sshll.u32 %s782_s22, 4  ;;  %s31_s25 = sadd.s32 1, %s776_s13  ;;  %s126_s23 = int_to_ptr.vmem [resolvable:$true] %s125_s23 }
  0x12   : > { %s1062_s21 = scalar_select %p858_p8, 1, 0 }
  0x13   : > { %p567_p9 = pneg %p858_p8  ;;  %s636_s28 = scalar_lea.hbm %s1052_s1, 1024 }
  0x14   : > { %p637_p12 = scmp.ne.s32.totalorder %s1052_s1, %s636_s28  ;;  %p643_p5 = scmp.lt.u32.totalorder %s636_s28, %s1052_s1 }
  0x15   : > { %p867_p11 = pnand %p567_p9, %p838_p1 }
  0x17   : > { %p638_p13 = pneg %p867_p11 }
  0x19   : > { %p639_p0 = pnand %p638_p13, %p637_p12 }
  0x1b   : > { %p640_p3 = pneg %p639_p0 }
  0x1d   : > { %p645_p7 = pnand %p643_p5, %p640_p3 }
  0x1f   : > { %648 = shalt.err (!%p645_p7)
}
  0x20   : > { %s649_s5 = scalar_lea.vmem %s126_s23, 1024  ;;  %p657_p1 = scmp.lt.s32.totalorder %s126_s23, %s126_s23 }
  0x21   : > { %p650_p9 = scmp.ne.s32.totalorder %s126_s23, %s649_s5  ;;  %p658_p4 = scmp.lt.s32.totalorder %s649_s5, %s649_s5 }
  0x23   : > { %p652_p10 = pnand %p650_p9, %p638_p13  ;;  %p659_p8 = por %p658_p4, %p657_p1 }
  0x25   : > { %p653_p6 = pneg %p652_p10 }
  0x27   : > { %p660_p2 = pnand %p659_p8, %p653_p6 }
  0x29   : > { %663 = shalt.err (!%p660_p2)
}
  0x2a   : > { %s783_s6 = smov 128   ;;  %s784_s7 = smov 8  }
  0x2b   : > { %570 = dma.hbm_to_vmem [thread:$0]  (!%p867_p11), %s1052_s1, 1024, %s126_s23, [#allocation6], %s783_s6, %s783_s6, %s784_s7  }
  0x2c   : > { %p33_p1 = scmp.ge.s32.totalorder %s31_s25, 2  ;;  %s40_s16 = sadd.s32 1, %s768_s11 }
  0x2d   : > { %p47_p2 = scmp.ne.s32.totalorder %s768_s11, %s764_s10  ;;  %p48_p4 = scmp.eq.s32.totalorder %s780_s14, 0 }
  0x2e   : > { %s1079_s25 = smov (%p33_p1, %s31_s25), 0  ;;  %p1065_p8 = scmp.ne.s32.totalorder %s1059_s18, 0 }
  0x2f   : > { %p897_p6 = por %p48_p4, %p47_p2  ;;  %s35_s26 = ssub.s32 %s776_s13, %s1079_s25 }
  0x30   : > { %p903_p10 = por %p1065_p8, %p47_p2  ;;  %p580_p12 = scmp.lt.s32.totalorder %s780_s14, 2 }
  0x31   : > { %p38_p11 = scmp.eq.s32.totalorder %s35_s26, 0  ;;  %s139_s23 = sand.u32 1, %s768_s11  }
  0x32   : > { %s469_s27 = sshll.u32 %s139_s23, 6  ;;  %s489_s29 = sshll.u32 %s776_s13, 10 }
  0x33   : > { %s912_s28 = scalar_select %p38_p11, %s768_s11, %s40_s16  }
  0x34   : > { %s918_s4 = scalar_lea.hbm %s1051_s0, %s489_s29  ;;  %s143_s18 = scalar_lea.vmem [#allocation2], %s469_s27 }
  0x35   : > { %s152_s5 = sshll.u32 %s143_s18, 4  ;;  %p924_p13 = pnand %p580_p12, %p897_p6  ;;  %s920_s5 = int_to_ptr.vmem [resolvable:$true] %s152_s5 }
  0x36   : > { %s928_s15 = scalar_lea.sflag [#allocation3], %s139_s23  ;;  %s664_s16 = scalar_lea.hbm %s918_s4, 1024 }
  0x37   : > { %p665_p0 = scmp.ne.s32.totalorder %s918_s4, %s664_s16  ;;  %p666_p3 = pneg %p924_p13 }
  0x38   : > { %s669_s22 = scalar_lea.hbm %s1051_s0, 2048  ;;  %p670_p9 = scmp.lt.u32.totalorder %s918_s4, %s1051_s0 }
  0x39   : > { %p667_p5 = pnand %p666_p3, %p665_p0  ;;  %p671_p1 = scmp.lt.u32.totalorder %s669_s22, %s664_s16 }
  0x3a   : > { %p673_p4 = scmp.lt.u32.totalorder %s664_s16, %s918_s4 }
  0x3b   : > { %p668_p7 = pneg %p667_p5  ;;  %p672_p2 = por %p671_p1, %p670_p9 }
  0x3d   : > { %p674_p6 = por %p673_p4, %p672_p2 }
  0x3f   : > { %p675_p8 = pnand %p674_p6, %p668_p7 }
  0x41   : > { %678 = shalt.err (!%p675_p8)
}
  0x42   : > { %s679_s23 = scalar_lea.vmem %s920_s5, 1024  ;;  %s785_s3 = smov [#allocation2]  }
  0x43   : > { %p680_p12 = scmp.ne.s32.totalorder %s920_s5, %s679_s23  ;;  %s684_s18 = sshll.u32 %s785_s3, 4  ;;  %s685_s18 = int_to_ptr.vmem [resolvable:$false] %s684_s18 }
  0x44   : > { %s686_s26 = scalar_lea.vmem %s685_s18, 2048  ;;  %p687_p5 = scmp.lt.s32.totalorder %s920_s5, %s685_s18 }
  0x45   : > { %p682_p11 = pnand %p680_p12, %p666_p3  ;;  %p688_p9 = scmp.lt.s32.totalorder %s686_s26, %s679_s23 }
  0x47   : > { %p683_p0 = pneg %p682_p11  ;;  %p689_p1 = por %p688_p9, %p687_p5 }
  0x49   : > { %p690_p2 = pnand %p689_p1, %p683_p0 }
  0x4b   : > { %693 = shalt.err (!%p690_p2)
}
  0x4c   : > { %574 = dma.hbm_to_vmem [thread:$0]  (!%p924_p13), %s918_s4, 1024, %s920_s5, %s928_s15, %s783_s6, %s783_s6, %s784_s7  }
  0x4d   : > { %p1068_p3 = scmp.ne.s32.totalorder %s1062_s21, 0 }
  0x4e   : > { %s962_s16 = sand.u32 (!%p1068_p3), 1, %s764_s10   ;;  %p1069_p7 = scmp.ne.s32.totalorder (!%p1068_p3), %s1060_s19, 0 }
  0x4f   : > { %164 = sbr.rel (%p1068_p3) target bundleno = 341 (0x155), region = 28  ;;  %s473_s27 = sshll.u32 (!%p1068_p3), %s962_s16, 6 }
  0x50   : > { %s167_s22 = scalar_lea.sflag (!%p1068_p3), [#allocation3], %s962_s16  ;;  %s968_s8 = scalar_lea.vmem (!%p1068_p3), [#allocation2], %s473_s27 }
  0x56   : > { %747 = dma.done.wait (%p1069_p7), %s167_s22, 1024  }
  0x57   : > { %749 = vsyncadd (%p1069_p7), %s167_s22, 4294966272  ;;  %p1070_p13 = scmp.ne.s32.totalorder %s1058_s17, 0 }
  0x59   : > { %751 = dma.done.wait (%p1070_p13), [#allocation6], 1024  }
  0x5a   : > { %753 = vsyncadd (%p1070_p13), [#allocation6], 4294966272  ;;  %v205_v0 = vld [vmem:[#allocation5] sm:$0xff]  ;;  %v206_v1 = vld [vmem:[#allocation5 + $0x8] sm:$0xff]  ;;  %vm213_vm0 = vcmask 523264   ;;  %s194_s17 = scalar_lea.vmem [#allocation7], %s473_s27 }
  0x5b   : > { %v207_v2 = vld [vmem:[#allocation5 + $0x10] sm:$0xff]  ;;  %v535_v3 = vpack.c.bf16 %v206_v1, %v205_v0  ;;  %v208_v4 = vld [vmem:[#allocation5 + $0x18] sm:$0xff]  ;;  %v209_v6 = vld [vmem:[#allocation5 + $0x20] sm:$0xff]  ;;  %s367_s19 = sshll.u32 %s194_s17, 4  ;;  %s490_s21 = sshll.u32 %s772_s12, 10  ;;  %s997_s19 = int_to_ptr.vmem [resolvable:$true] %s367_s19 }
  0x5c   : > { %v539_v5 = vpack.c.bf16 %v208_v4, %v207_v2  ;;  %v210_v7 = vld [vmem:[#allocation5 + $0x28] sm:$0xff]  ;;  %v197_v8 = vld [vmem:[%s968_s8] sm:$0xff]  ;;  %v211_v11 = vld [vmem:[#allocation5 + $0x30] sm:$0xff]  ;;  %s1002_s4 = scalar_lea.hbm %s1053_s2, %s490_s21  ;;  %s352_s12 = scalar_lea.sflag [#allocation4], %s962_s16 }
  0x5d   : > { %536 = vmatprep.subr.bf16.mxu0 %v535_v3  ;;  %551 = vmatprep.subr.bf16.mxu1 %v535_v3  ;;  %v201_v9 = vld [vmem:[%s968_s8 + $0x20] sm:$0xff]  ;;  %v543_v10 = vpack.c.bf16 %v210_v7, %v209_v6  ;;  %v212_v12 = vld [vmem:[#allocation5 + $0x38] sm:$0xff]  ;;  %v198_v14 = vld [vmem:[%s968_s8 + $0x8] sm:$0xff]  ;;  %s694_s5 = scalar_lea.vmem %s997_s19, 1024  ;;  %s786_s15 = smov [#allocation7]  }
  0x5e   : > { %538 = vmatpush3.bf16.msra.mxu0 %v535_v3  ;;  %555 = vmatpush3.bf16.msra.mxu1 %v535_v3  ;;  %v547_v13 = vpack.c.bf16 %v212_v12, %v211_v11  ;;  %v202_v15 = vld [vmem:[%s968_s8 + $0x28] sm:$0xff]  ;;  %v199_v16 = vld [vmem:[%s968_s8 + $0x10] sm:$0xff]  ;;  %v200_v18 = vld [vmem:[%s968_s8 + $0x18] sm:$0xff]  ;;  %p695_p4 = scmp.ne.s32.totalorder %s997_s19, %s694_s5  ;;  %s698_s29 = sshll.u32 %s786_s15, 4  ;;  %s699_s29 = int_to_ptr.vmem [resolvable:$false] %s698_s29 }
  0x5f   : > { %540 = vmatprep.subr.bf16.mxu0 %v539_v5  ;;  %552 = vmatprep.subr.bf16.mxu1 %v539_v5  ;;  %v203_v17 = vld [vmem:[%s968_s8 + $0x30] sm:$0xff]  ;;  %v204_v19 = vld [vmem:[%s968_s8 + $0x38] sm:$0xff]  ;;  %s700_s30 = scalar_lea.vmem %s699_s29, 2048  ;;  %p701_p12 = scmp.lt.s32.totalorder %s997_s19, %s699_s29 }
  0x60   : > { %523 = vmatprep.mubr.msk.f32.mxu0 %vm213_vm0, %v197_v8  ;;  %529 = vmatprep.mubr.msk.f32.mxu1 %vm213_vm0, %v201_v9  ;;  %p696_p6 = pnand %p695_p4, %p903_p10  ;;  %p702_p11 = scmp.lt.s32.totalorder %s700_s30, %s694_s5 }
  0x62   : > { %542 = vmatpush3.bf16.msra.mxu0 %v539_v5  ;;  %556 = vmatpush3.bf16.msra.mxu1 %v539_v5  ;;  %p697_p8 = pneg %p696_p6  ;;  %p703_p0 = por %p702_p11, %p701_p12 }
  0x63   : > { %544 = vmatprep.subr.bf16.mxu0 %v543_v10  ;;  %553 = vmatprep.subr.bf16.mxu1 %v543_v10 }
  0x64   : > { %p704_p5 = pnand %p703_p0, %p697_p8 }
  0x66   : > { %546 = vmatpush3.bf16.msra.mxu0 %v543_v10  ;;  %557 = vmatpush3.bf16.msra.mxu1 %v543_v10 }
  0x67   : > { %548 = vmatprep.subr.bf16.mxu0 %v547_v13  ;;  %554 = vmatprep.subr.bf16.mxu1 %v547_v13 }
  0x6a   : > { %550 = vmatpush3.bf16.msra.mxu0 %v547_v13  ;;  %558 = vmatpush3.bf16.msra.mxu1 %v547_v13 }
  0x6d   : > { %524 = vmatmul.mubr.msk.f32.vlgmr.msra.gmra.mrb[0].mxu0 %vm213_vm0, %v198_v14  ;;  %530 = vmatmul.mubr.msk.f32.vlgmr.msra.gmra.mrb[0].mxu1 %vm213_vm0, %v202_v15 }
  0x6e   : > { %526 = vmatprep.mubr.msk.f32.mxu0 %vm213_vm0, %v199_v16  ;;  %532 = vmatprep.mubr.msk.f32.mxu1 %vm213_vm0, %v203_v17 }
  0x71   : > { %527 = vmatmul.mubr.msk.f32.gmra.mrb[2].mxu0 %vm213_vm0, %v200_v18  ;;  %533 = vmatmul.mubr.msk.f32.gmra.mrb[2].mxu1 %vm213_vm0, %v204_v19 }
 0x140   : > { %v525_v20 = vpop.f32.mrb[0].mxu0  ;;  %v531_v21 = vpop.f32.mrb[0].mxu1 }
 0x141   : > { %344 = vst [vmem:[%s194_s17 + $0x8] sm:$0xff] %v525_v20  ;;  %348 = vst [vmem:[%s194_s17 + $0x28] sm:$0xff] %v531_v21  ;;  %v304_v22 = vpop.f32.mrb[1].mxu0  ;;  %v324_v23 = vpop.f32.mrb[1].mxu1 }
 0x142   : > { %343 = vst [vmem:[%s194_s17] sm:$0xff] %v304_v22  ;;  %347 = vst [vmem:[%s194_s17 + $0x20] sm:$0xff] %v324_v23 }
 0x144   : > { %v528_v24 = vpop.f32.mrb[2].mxu0  ;;  %v534_v25 = vpop.f32.mrb[2].mxu1 }
 0x145   : > { %346 = vst [vmem:[%s194_s17 + $0x18] sm:$0xff] %v528_v24  ;;  %350 = vst [vmem:[%s194_s17 + $0x38] sm:$0xff] %v534_v25  ;;  %v314_v26 = vpop.f32.mrb[3].mxu0  ;;  %v334_v27 = vpop.f32.mrb[3].mxu1 }
 0x146   : > { %345 = vst [vmem:[%s194_s17 + $0x10] sm:$0xff] %v314_v26  ;;  %349 = vst [vmem:[%s194_s17 + $0x30] sm:$0xff] %v334_v27 }
 0x147   : > { %707 = shalt.err (!%p704_p5)
}
 0x148   : > { %s708_s23 = scalar_lea.hbm %s1002_s4, 1024  ;;  %s712_s26 = scalar_lea.hbm %s1053_s2, 2048 }
 0x149   : > { %p709_p9 = scmp.ne.s32.totalorder %s1002_s4, %s708_s23  ;;  %p713_p3 = scmp.lt.u32.totalorder %s1002_s4, %s1053_s2 }
 0x14a   : > { %p714_p7 = scmp.lt.u32.totalorder %s712_s26, %s708_s23  ;;  %p716_p4 = scmp.lt.u32.totalorder %s708_s23, %s1002_s4 }
 0x14b   : > { %p710_p1 = pnand %p709_p9, %p903_p10 }
 0x14c   : > { %p715_p13 = por %p714_p7, %p713_p3 }
 0x14d   : > { %p711_p2 = pneg %p710_p1 }
 0x14e   : > { %p717_p6 = por %p716_p4, %p715_p13 }
 0x150   : > { %p718_p8 = pnand %p717_p6, %p711_p2 }
 0x152   : > { %721 = shalt.err (!%p718_p8)
}
 0x153   : > { %s787_s8 = smov 128   ;;  %s788_s17 = smov 8  }
 0x154   : > { %565 = dma.vmem_to_hbm [thread:$0]  (%p903_p10), %s997_s19, 1024, %s1002_s4, %s352_s12, %s787_s8, %s787_s8, %s788_s17  }
 0x155 PF: > { %s382_s21 = sand.u32 1, %s760_s9   ;;  %p1071_p12 = scmp.ne.s32.totalorder %s1061_s20, 0 }
 0x156   : > { %p1072_p11 = scmp.ge.s32.totalorder %s780_s14, 2  ;;  %s383_s6 = scalar_lea.sflag [#allocation4], %s382_s21 }
 0x158   : > { %p576_p0 = pnand %p1072_p11, %p1071_p12 }
 0x15a   : > { %755 = dma.done.wait (!%p576_p0), %s383_s6, 1024  }
 0x15b   : > { %757 = vsyncadd (!%p576_p0), %s383_s6, 4294966272  ;;  %s19_s14 = sadd.s32 1, %s780_s14   ;;  %s1073_s9 = smov %s764_s10 }
 0x15c   : > { %p16_p5 = scmp.ge.s32.totalorder %s19_s14, 4   ;;  %s1074_s10 = smov %s768_s11 }
 0x15d   : > { %s1075_s11 = smov %s912_s28  ;;  %s1076_s12 = smov %s776_s13 }
 0x15e   : > { %s1077_s13 = smov %s1079_s25  ;;  %18 = sbr.rel (!%p16_p5) target bundleno = 7 (0x7), region = 77 }
 0x165   :  { %388 = vsyncpa [#allocation3], 1 }
 0x166   :  { %390 = vsyncpa [#allocation3 + $0x1], 1 }
 0x167   :  { %391 = vsyncpa [#allocation6], 1 }
 0x168   :  { %392 = vsyncpa [#allocation4], 1 }
 0x169   :  { %394 = vsyncpa [#allocation4 + $0x1], 1 }

</bundles_post_ra>
